<compile_context>
chip_gen: v5e
topology: v5e:2x2
jax: 0.10.0
libtpu: 0.0.40
codegen_flags: <defaults>
</compile_context>

<pallas_src>
import math

import jax
import jax.numpy as jnp
from jax.experimental import pallas as pl
from jax.experimental.pallas import tpu as pltpu

H1_PAD = 512   # 400 padded up to a multiple of 128/256
H2_PAD = 384   # 300 padded to a multiple of 128 (do NOT bump to 512: hurts v5e)
LANE = 128


def _round_up(n, m):
    return ((n + m - 1) // m) * m


def _cdiv(a, b):
    return -(-a // b)


# ----------------------------------------------------------------------------
# Kernel: one batch tile per grid step; all three layers fused so the
# intermediates h1/h2 never leave VMEM.
# ----------------------------------------------------------------------------
def actor_kernel(x_ref, w1_ref, b1_ref, w2_ref, b2_ref, w3_ref, b3_ref, o_ref):
    x = x_ref[...]                                    # already bf16 (cast in wrapper)

    h1 = jnp.dot(x, w1_ref[...], preferred_element_type=jnp.float32) + b1_ref[...]
    h1 = jnp.maximum(h1, 0.0).astype(jnp.bfloat16)    # ReLU in f32 -> bf16 for MXU

    h2 = jnp.dot(h1, w2_ref[...], preferred_element_type=jnp.float32) + b2_ref[...]
    h2 = jnp.maximum(h2, 0.0)                         # stays f32 (f32 final layer)

    h3 = jnp.dot(h2, w3_ref[...], preferred_element_type=jnp.float32) + b3_ref[...]
    o_ref[...] = jnp.tanh(h3).astype(o_ref.dtype)     # tanh (EUP), lane-dense bf16 store


# ----------------------------------------------------------------------------
# Batch-tile selection: big, balanced tiles; >= 2 tiles when B is large enough
# so the "parallel" batch axis can shard across both v7x TensorCores.
# ----------------------------------------------------------------------------
def _choose_tile_b(B, *, tile_b_max=1024, min_split=512):
    B8 = _round_up(max(B, 1), 8)
    if B8 <= min_split:
        return B8, B8                      # single tile; tiny batches stay tiny
    n_tiles = max(2, _cdiv(B8, tile_b_max))
    tile_b = _round_up(_cdiv(B8, n_tiles), 8)
    return tile_b, tile_b * n_tiles


# ----------------------------------------------------------------------------
# Wrapper: 1-D batch grid, weights resident, ragged batch handled by padding.
# Returns the padded (B_pad, A_pad) bf16 output; slice/cast in the caller
# (under jit the slice fuses instead of re-reading the padded output).
# ----------------------------------------------------------------------------
def actor_forward_padded(x, padded_params, *, tile_b_max=1024):
    w1, b1, w2, b2, w3, b3 = padded_params
    B, S = x.shape
    A_pad = w3.shape[1]

    x = x.astype(jnp.bfloat16)             # cast once here, not per-tile in-kernel
    tile_b, B_pad = _choose_tile_b(B, tile_b_max=tile_b_max)
    if B_pad != B:
        x = jnp.pad(x, ((0, B_pad - B), (0, 0)))
    grid = (B_pad // tile_b,)

    def resident(shape):
        # Constant index_map -> block stays resident in VMEM across batch tiles.
        return pl.BlockSpec(shape, lambda i: (0, 0))

    out = pl.pallas_call(
        actor_kernel,
        out_shape=jax.ShapeDtypeStruct((B_pad, A_pad), jnp.bfloat16),
        grid=grid,
        in_specs=[
            pl.BlockSpec((tile_b, S), lambda i: (i, 0)),   # x: streamed batch tiles
            resident(w1.shape), resident(b1.shape),
            resident(w2.shape), resident(b2.shape),
            resident(w3.shape), resident(b3.shape),
        ],
        out_specs=pl.BlockSpec((tile_b, A_pad), lambda i: (i, 0)),
        compiler_params=pltpu.CompilerParams(
            # Independent batch tiles -> shard across TensorCores on v7x.
            dimension_semantics=("parallel",),
        ),
    )(x, w1, b1, w2, b2, w3, b3)
    return out


def actor_apply(x, padded_params, action_dim, *, tile_b_max=1024,
                out_dtype=jnp.float32):
    """Call under jax.jit so the final slice/cast fuses with the kernel output."""
    B = x.shape[0]
    out = actor_forward_padded(x, padded_params, tile_b_max=tile_b_max)
    return out[:B, :action_dim].astype(out_dtype)


# ----------------------------------------------------------------------------
# Parameter init (mirrors the PyTorch module) + padding/casting for the kernel.
# Weights stored (in_features, out_features), i.e. transposed vs. nn.Linear.
# ----------------------------------------------------------------------------
def init_actor_params(key, state_dim, action_dim):
    k1, k2, k3, kb1, kb2, kb3 = jax.random.split(key, 6)

    def xavier_uniform(k, fan_in, fan_out):
        bound = math.sqrt(6.0 / (fan_in + fan_out))
        return jax.random.uniform(k, (fan_in, fan_out), jnp.float32, -bound, bound)

    def linear_bias(k, fan_in, fan_out):
        # PyTorch nn.Linear default bias init: U(-1/sqrt(fan_in), 1/sqrt(fan_in))
        bound = 1.0 / math.sqrt(fan_in)
        return jax.random.uniform(k, (1, fan_out), jnp.float32, -bound, bound)

    w1 = xavier_uniform(k1, state_dim, 400)
    b1 = linear_bias(kb1, state_dim, 400)
    w2 = xavier_uniform(k2, 400, 300)
    b2 = linear_bias(kb2, 400, 300)
    w3 = jax.random.uniform(k3, (300, action_dim), jnp.float32, -0.003, 0.003)
    b3 = linear_bias(kb3, 300, action_dim)
    return (w1, b1, w2, b2, w3, b3)


def pad_and_cast_params(params, state_dim, action_dim):
    """Zero-pad hidden/output dims to lane-friendly sizes.

    w1/w2 -> bf16 (big layers); w3 and all biases stay f32 (small final layer
    kept at full precision for fidelity to the PyTorch forward).
    """
    w1, b1, w2, b2, w3, b3 = params
    A_pad = _round_up(action_dim, LANE)

    def pad2(a, rows, cols):
        return jnp.pad(a, ((0, rows - a.shape[0]), (0, cols - a.shape[1])))

    w1p = pad2(w1, state_dim, H1_PAD).astype(jnp.bfloat16)
    b1p = pad2(b1, 1, H1_PAD)                       # f32, padded cols exactly 0
    w2p = pad2(w2, H1_PAD, H2_PAD).astype(jnp.bfloat16)
    b2p = pad2(b2, 1, H2_PAD)
    w3p = pad2(w3, H2_PAD, A_pad)                   # f32 final layer
    b3p = pad2(b3, 1, A_pad)
    return (w1p, b1p, w2p, b2p, w3p, b3p)


# ----------------------------------------------------------------------------
# Pure-JAX references for correctness checking.
# ----------------------------------------------------------------------------
def actor_reference_mirror(x, padded_params, action_dim):
    """Mirrors the kernel math exactly (bf16 x/w1/w2, f32 final layer, bf16 out)."""
    w1, b1, w2, b2, w3, b3 = padded_params
    xb = x.astype(jnp.bfloat16)
    h1 = jnp.maximum(jnp.dot(xb, w1, preferred_element_type=jnp.float32) + b1, 0.0)
    h1 = h1.astype(jnp.bfloat16)
    h2 = jnp.maximum(jnp.dot(h1, w2, preferred_element_type=jnp.float32) + b2, 0.0)
    h3 = jnp.dot(h2, w3, preferred_element_type=jnp.float32) + b3
    return jnp.tanh(h3).astype(jnp.bfloat16)[:, :action_dim].astype(jnp.float32)


def actor_reference_f32(x, params):
    """Original full-f32 semantics of the PyTorch forward."""
    w1, b1, w2, b2, w3, b3 = params
    h1 = jnp.maximum(x @ w1 + b1, 0.0)
    h2 = jnp.maximum(h1 @ w2 + b2, 0.0)
    return jnp.tanh(h2 @ w3 + b3)


if __name__ == "__main__":
    key = jax.random.PRNGKey(0)
    kx, kx2, kp = jax.random.split(key, 3)

    batch, state_dim, action_dim = 2, 32, 8
    limit = jnp.ones((action_dim,), jnp.float32)  # unused in forward (matches PyTorch)

    x = jax.random.normal(kx, (batch, state_dim), jnp.float32)
    params_f32 = init_actor_params(kp, state_dim, action_dim)
    params_pad = pad_and_cast_params(params_f32, state_dim, action_dim)

    apply_fn = jax.jit(lambda xx: actor_apply(xx, params_pad, action_dim))

    # --- small batch (grid = (1,)) ---
    out = jax.block_until_ready(apply_fn(x))
    assert out.shape == (batch, action_dim)

    ref_m = actor_reference_mirror(x, params_pad, action_dim)
    assert jnp.allclose(out, ref_m, atol=2e-2, rtol=2e-2), "mismatch vs mirror reference"

    ref_f32 = actor_reference_f32(x, params_f32)
    assert jnp.allclose(out, ref_f32, atol=5e-2, rtol=5e-2), "mismatch vs f32 reference"

    # --- larger batch exercises the multi-tile (>=2 grid steps) path ---
    big_b = 600
    xb = jax.random.normal(kx2, (big_b, state_dim), jnp.float32)
    out_b = jax.block_until_ready(apply_fn(xb))
    assert out_b.shape == (big_b, action_dim)
    ref_b = actor_reference_f32(xb, params_f32)
    assert jnp.allclose(out_b, ref_b, atol=5e-2, rtol=5e-2), "big-batch mismatch"

    print("KERNEL_OK")
</pallas_src>

<mosaic_0001>
module attributes {stable_mosaic.version = 11 : i64} {
  func.func @actor_kernel(%arg0: i32, %arg1: memref<8x32xbf16, #tpu.memory_space<vmem>>, %arg2: memref<32x512xbf16, #tpu.memory_space<vmem>>, %arg3: memref<1x512xf32, #tpu.memory_space<vmem>>, %arg4: memref<512x384xbf16, #tpu.memory_space<vmem>>, %arg5: memref<1x384xf32, #tpu.memory_space<vmem>>, %arg6: memref<384x128xf32, #tpu.memory_space<vmem>>, %arg7: memref<1x128xf32, #tpu.memory_space<vmem>>, %arg8: memref<8x128xbf16, #tpu.memory_space<vmem>>) attributes {dimension_semantics = [#tpu.dimension_semantics<parallel>], iteration_bounds = array<i64: 1>, scalar_prefetch = 0 : i64, scratch_operands = 0 : i64, tpu.core_type = #tpu.core_type<tc>, window_params = [{transform_indices = @transform_0, window_bounds = array<i64: 8, 32>}, {pipeline_mode = #tpu.pipeline_mode<synchronous>, transform_indices = @transform_1, window_bounds = array<i64: 32, 512>}, {pipeline_mode = #tpu.pipeline_mode<synchronous>, transform_indices = @transform_2, window_bounds = array<i64: 1, 512>}, {pipeline_mode = #tpu.pipeline_mode<synchronous>, transform_indices = @transform_3, window_bounds = array<i64: 512, 384>}, {pipeline_mode = #tpu.pipeline_mode<synchronous>, transform_indices = @transform_4, window_bounds = array<i64: 1, 384>}, {pipeline_mode = #tpu.pipeline_mode<synchronous>, transform_indices = @transform_5, window_bounds = array<i64: 384, 128>}, {pipeline_mode = #tpu.pipeline_mode<synchronous>, transform_indices = @transform_6, window_bounds = array<i64: 1, 128>}, {transform_indices = @transform_7, window_bounds = array<i64: 8, 128>}]} {
    %c0 = arith.constant 0 : index
    %c0_0 = arith.constant 0 : index
    %0 = vector.load %arg1[%c0, %c0_0] : memref<8x32xbf16, #tpu.memory_space<vmem>>, vector<8x32xbf16>
    %c0_1 = arith.constant 0 : index
    %c0_2 = arith.constant 0 : index
    %1 = vector.load %arg2[%c0_1, %c0_2] : memref<32x512xbf16, #tpu.memory_space<vmem>>, vector<32x512xbf16>
    %cst = arith.constant dense<0.000000e+00> : vector<8x512xf32>
    %2 = tpu.matmul %0, %1, %cst {dimension_numbers = #tpu.dot_dimension_numbers<[1], [0], [0], [1], [0, 0, 1, 1], [], []>} : vector<8x32xbf16>, vector<32x512xbf16>, vector<8x512xf32> -> vector<8x512xf32>
    %c0_3 = arith.constant 0 : index
    %c0_4 = arith.constant 0 : index
    %3 = vector.load %arg3[%c0_3, %c0_4] : memref<1x512xf32, #tpu.memory_space<vmem>>, vector<1x512xf32>
    %4 = vector.broadcast %3 : vector<1x512xf32> to vector<8x512xf32>
    %5 = arith.addf %2, %4 : vector<8x512xf32>
    %cst_5 = arith.constant 0.000000e+00 : f32
    %6 = vector.broadcast %cst_5 : f32 to vector<8x512xf32>
    %7 = arith.maximumf %5, %6 : vector<8x512xf32>
    %8 = arith.truncf %7 : vector<8x512xf32> to vector<8x512xbf16>
    %c0_6 = arith.constant 0 : index
    %c0_7 = arith.constant 0 : index
    %9 = vector.load %arg4[%c0_6, %c0_7] : memref<512x384xbf16, #tpu.memory_space<vmem>>, vector<512x384xbf16>
    %cst_8 = arith.constant dense<0.000000e+00> : vector<8x384xf32>
    %10 = tpu.matmul %8, %9, %cst_8 {dimension_numbers = #tpu.dot_dimension_numbers<[1], [0], [0], [1], [0, 0, 1, 1], [], []>} : vector<8x512xbf16>, vector<512x384xbf16>, vector<8x384xf32> -> vector<8x384xf32>
    %c0_9 = arith.constant 0 : index
    %c0_10 = arith.constant 0 : index
    %11 = vector.load %arg5[%c0_9, %c0_10] : memref<1x384xf32, #tpu.memory_space<vmem>>, vector<1x384xf32>
    %12 = vector.broadcast %11 : vector<1x384xf32> to vector<8x384xf32>
    %13 = arith.addf %10, %12 : vector<8x384xf32>
    %cst_11 = arith.constant 0.000000e+00 : f32
    %14 = vector.broadcast %cst_11 : f32 to vector<8x384xf32>
    %15 = arith.maximumf %13, %14 : vector<8x384xf32>
    %c0_12 = arith.constant 0 : index
    %c0_13 = arith.constant 0 : index
    %16 = vector.load %arg6[%c0_12, %c0_13] : memref<384x128xf32, #tpu.memory_space<vmem>>, vector<384x128xf32>
    %cst_14 = arith.constant dense<0.000000e+00> : vector<8x128xf32>
    %17 = tpu.matmul %15, %16, %cst_14 {dimension_numbers = #tpu.dot_dimension_numbers<[1], [0], [0], [1], [0, 0, 1, 1], [], []>} : vector<8x384xf32>, vector<384x128xf32>, vector<8x128xf32> -> vector<8x128xf32>
    %c0_15 = arith.constant 0 : index
    %c0_16 = arith.constant 0 : index
    %18 = vector.load %arg7[%c0_15, %c0_16] : memref<1x128xf32, #tpu.memory_space<vmem>>, vector<1x128xf32>
    %19 = vector.broadcast %18 : vector<1x128xf32> to vector<8x128xf32>
    %20 = arith.addf %17, %19 : vector<8x128xf32>
    %21 = math.tanh %20 : vector<8x128xf32>
    %22 = arith.truncf %21 : vector<8x128xf32> to vector<8x128xbf16>
    %c0_17 = arith.constant 0 : index
    %c0_18 = arith.constant 0 : index
    %23 = vector.load %arg8[%c0_17, %c0_18] : memref<8x128xbf16, #tpu.memory_space<vmem>>, vector<8x128xbf16>
    tpu.vector_store %arg8[%c0_17, %c0_18], %22 {strides = array<i32>} : memref<8x128xbf16, #tpu.memory_space<vmem>>, vector<8x128xbf16>,
    return
  }
  func.func @transform_0(%arg0: i32) -> (i32, i32) {
    %c0_i32 = arith.constant 0 : i32
    %c0_i32_0 = arith.constant 0 : i32
    return %arg0, %c0_i32 : i32, i32
  }
  func.func @transform_1(%arg0: i32) -> (i32, i32) {
    %c0_i32 = arith.constant 0 : i32
    %c0_i32_0 = arith.constant 0 : i32
    %c0_i32_1 = arith.constant 0 : i32
    return %c0_i32, %c0_i32_0 : i32, i32
  }
  func.func @transform_2(%arg0: i32) -> (i32, i32) {
    %c0_i32 = arith.constant 0 : i32
    %c0_i32_0 = arith.constant 0 : i32
    %c0_i32_1 = arith.constant 0 : i32
    return %c0_i32, %c0_i32_0 : i32, i32
  }
  func.func @transform_3(%arg0: i32) -> (i32, i32) {
    %c0_i32 = arith.constant 0 : i32
    %c0_i32_0 = arith.constant 0 : i32
    %c0_i32_1 = arith.constant 0 : i32
    return %c0_i32, %c0_i32_0 : i32, i32
  }
  func.func @transform_4(%arg0: i32) -> (i32, i32) {
    %c0_i32 = arith.constant 0 : i32
    %c0_i32_0 = arith.constant 0 : i32
    %c0_i32_1 = arith.constant 0 : i32
    return %c0_i32, %c0_i32_0 : i32, i32
  }
  func.func @transform_5(%arg0: i32) -> (i32, i32) {
    %c0_i32 = arith.constant 0 : i32
    %c0_i32_0 = arith.constant 0 : i32
    %c0_i32_1 = arith.constant 0 : i32
    return %c0_i32, %c0_i32_0 : i32, i32
  }
  func.func @transform_6(%arg0: i32) -> (i32, i32) {
    %c0_i32 = arith.constant 0 : i32
    %c0_i32_0 = arith.constant 0 : i32
    %c0_i32_1 = arith.constant 0 : i32
    return %c0_i32, %c0_i32_0 : i32, i32
  }
  func.func @transform_7(%arg0: i32) -> (i32, i32) {
    %c0_i32 = arith.constant 0 : i32
    %c0_i32_0 = arith.constant 0 : i32
    return %arg0, %c0_i32 : i32, i32
  }
}

</mosaic_0001>

<bundles_post_ra>
// kernel: _lambda_.1
= control target key start
LH: loop header
LB: loop body
LE: loop exit
PB: predicated region body
PF: predicated region fallthrough
CT: control target
= control target key end

     0   :  { %12 = vsyncpa [#allocation3], 0  ;;  %s1846_s0 = inlined_call_operand.vmem [shape: bf16[8,32], index: 0, kind: input, shape index: {}]   ;;  %s1847_s1 = inlined_call_operand.hbm [shape: bf16[32,512], index: 1, kind: input, shape index: {}]   ;;  %s1848_s2 = inlined_call_operand.vmem [shape: f32[1,512], index: 2, kind: input, shape index: {}]   ;;  %s1849_s3 = inlined_call_operand.hbm [shape: bf16[512,384], index: 3, kind: input, shape index: {}]   ;;  %s1850_s4 = inlined_call_operand.vmem [shape: f32[1,384], index: 4, kind: input, shape index: {}]   ;;  %s1851_s5 = inlined_call_operand.hbm [shape: f32[384,128], index: 5, kind: input, shape index: {}]   ;;  %s1852_s6 = inlined_call_operand.vmem [shape: f32[1,128], index: 6, kind: input, shape index: {}]   ;;  %s1853_s7 = inlined_call_operand.vmem [shape: bf16[8,128], index: 7, kind: output, shape index: {}]  }
   0x1   :  { %13 = vsyncpa [#allocation5], 0  ;;  %s35_s26 = sshll.u32 %s1849_s3, 4  ;;  %s1737_s27 = smov [#allocation4]   ;;  %s36_s26 = int_to_ptr.hbm [resolvable:$true] %s35_s26 }
   0x2   :  { %s37_s28 = sshll.u32 %s1737_s27, 4  ;;  %s20_s8 = sshll.u32 %s1847_s1, 4  ;;  %s38_s28 = int_to_ptr.vmem [resolvable:$true] %s37_s28  ;;  %s21_s8 = int_to_ptr.hbm [resolvable:$true] %s20_s8 }
   0x3   :  { %s1738_s9 = smov 192   ;;  %s1739_s10 = smov 12  }
   0x4   :  { %43 = dma.hbm_to_vmem [thread:$0]  %s36_s26, 12288, %s38_s28, [#allocation5], %s1738_s9, %s1738_s9, %s1739_s10  }
   0x5   :  { %s1740_s11 = smov [#allocation2]   ;;  %s1741_s13 = smov 256  }
   0x6   :  { %s22_s12 = sshll.u32 %s1740_s11, 4  ;;  %s1742_s14 = smov 16   ;;  %s23_s12 = int_to_ptr.vmem [resolvable:$true] %s22_s12 }
   0x7   :  { %28 = dma.hbm_to_vmem [thread:$0]  %s21_s8, 1024, %s23_s12, [#allocation3], %s1741_s13, %s1741_s13, %s1742_s14  }
   0x8   :  { %s50_s16 = sshll.u32 %s1851_s5, 4  ;;  %s1743_s17 = smov [#allocation6]   ;;  %s51_s16 = int_to_ptr.hbm [resolvable:$true] %s50_s16 }
   0x9   :  { %s52_s18 = sshll.u32 %s1743_s17, 4  ;;  %s1744_s19 = smov 128   ;;  %s53_s18 = int_to_ptr.vmem [resolvable:$true] %s52_s18 }
   0xa   :  { %s1745_s1 = smov 8  }
   0xb   :  { %58 = dma.hbm_to_vmem [thread:$0]  %s51_s16, 6144, %s53_s18, [#allocation5], %s1744_s19, %s1744_s19, %s1745_s1  }
   0xc   :  { %1733 = dma.done.wait [#allocation3], 1024  }
   0xd   :  { %1734 = vsyncadd [#allocation3], 4294966272 }
   0xe   :  { %1735 = dma.done.wait [#allocation5], 18432  }
   0xf   :  { %1736 = vsyncadd [#allocation5], 4294948864  ;;  %v1143_v0 = vld [vmem:[#allocation2 + $0x20] sm:$0xf]  ;;  %v1551_v1 = vld [vmem:[#allocation2 + $0x2c] sm:$0xf0] }
  0x10   :  { %v1549_v2 = vld [vmem:[#allocation2 + $0x24] sm:$0xf]  ;;  %v1144_v3 = vor.u32 %v1551_v1, %v1143_v0  ;;  %v1145_v4 = vld [vmem:[#allocation2 + $0x30] sm:$0xf0]  ;;  %v1151_v5 = vld [vmem:[#allocation2 + $0x28] sm:$0xf] }
  0x11   :  { %v1552_v6 = vld [vmem:[#allocation2 + $0x34] sm:$0xf0]  ;;  %v1148_v7 = vor.u32 %v1549_v2, %v1145_v4  ;;  %v1127_v9 = vld [vmem:[#allocation2] sm:$0xf]  ;;  %v1547_v10 = vld [vmem:[#allocation2 + $0xc] sm:$0xf0] }
  0x12   :  { %v1152_v8 = vor.u32 %v1552_v6, %v1151_v5  ;;  %v1545_v11 = vld [vmem:[#allocation2 + $0x4] sm:$0xf]  ;;  %143 = vmatpush.bf16.msra.mxu3 %v1144_v3  ;;  %v1128_v12 = vor.u32 %v1547_v10, %v1127_v9  ;;  %v1129_v13 = vld [vmem:[#allocation2 + $0x10] sm:$0xf0]  ;;  %v1135_v14 = vld [vmem:[#allocation2 + $0x8] sm:$0xf] }
  0x13   :  { %v1548_v15 = vld [vmem:[#allocation2 + $0x14] sm:$0xf0]  ;;  %156 = vmatpush.bf16.msra.mxu1 %v1148_v7  ;;  %v1132_v16 = vor.u32 %v1545_v11, %v1129_v13  ;;  %vm133_vm0 = vcmask 261120   ;;  %v1550_v18 = vld [vmem:[#allocation2 + $0x2c] sm:$0xf] }
  0x14   :  { %169 = vmatpush.bf16.msra.mxu2 %v1152_v8  ;;  %v1136_v17 = vor.u32 %v1548_v15, %v1135_v14  ;;  %v1153_v19 = vld [vmem:[#allocation2 + $0x38] sm:$0xf0]  ;;  %v1798_v20 = vld [vmem:[%s1846_s0] sm:$0xf]  ;;  %v1546_v22 = vld [vmem:[#allocation2 + $0xc] sm:$0xf] }
  0x15   :  { %v1156_v21 = vor.u32 %v1550_v18, %v1153_v19  ;;  %v1137_v23 = vld [vmem:[#allocation2 + $0x18] sm:$0xf0]  ;;  %v1343_v24 = vld [vmem:[#allocation4 + $0x168] sm:$0xf]  ;;  %v1599_v25 = vld [vmem:[#allocation4 + $0x170] sm:$0xf0] }
  0x16   :  { %v1331_v26 = vld [vmem:[#allocation4 + $0x150] sm:$0xf]  ;;  %v1596_v27 = vld [vmem:[#allocation4 + $0x158] sm:$0xf0]  ;;  %144 = vmatpush.bf16.msra.mxu3 %v1128_v12  ;;  %v1344_v28 = vor.u32 %v1599_v25, %v1343_v24  ;;  %v1247_v29 = vld [vmem:[#allocation4 + $0xa8] sm:$0xf]  ;;  %v1140_v34 = vor.u32 %v1546_v22, %v1137_v23 }
  0x17   :  { %v1575_v30 = vld [vmem:[#allocation4 + $0xb0] sm:$0xf0]  ;;  %v1439_v31 = vld [vmem:[#allocation4 + $0x228] sm:$0xf]  ;;  %157 = vmatpush.bf16.msra.mxu1 %v1132_v16  ;;  %v1332_v35 = vor.u32 %v1596_v27, %v1331_v26  ;;  %v1235_v37 = vld [vmem:[#allocation4 + $0x90] sm:$0xf] }
  0x18   :  { %170 = vmatpush.bf16.msra.mxu2 %v1136_v17  ;;  %v1248_v32 = vor.u32 %v1575_v30, %v1247_v29  ;;  %v1623_v33 = vld [vmem:[#allocation4 + $0x230] sm:$0xf0]  ;;  %v1572_v38 = vld [vmem:[#allocation4 + $0x98] sm:$0xf0]  ;;  %v1427_v39 = vld [vmem:[#allocation4 + $0x210] sm:$0xf] }
  0x19   :  { %v1440_v36 = vor.u32 %v1623_v33, %v1439_v31  ;;  %1157 = vmatmul.msk.bf16.vlgmr.msra.gmra.mxu3 %vm133_vm0, %v1798_v20  ;;  %v1319_v40 = vld [vmem:[#allocation4 + $0x138] sm:$0xf]  ;;  %v1593_v41 = vld [vmem:[#allocation4 + $0x140] sm:$0xf0]  ;;  %v1236_v42 = vor.u32 %v1572_v38, %v1235_v37  ;;  %v1620_v43 = vld [vmem:[#allocation4 + $0x218] sm:$0xf0] }
  0x1a   :  { %182 = vmatpush.bf16.msrb.mxu3 %v1156_v21  ;;  %845 = vmatpush.bf16.msra.mxu0 %v1248_v32  ;;  %v1223_v44 = vld [vmem:[#allocation4 + $0x78] sm:$0xf]  ;;  %v1569_v45 = vld [vmem:[#allocation4 + $0x80] sm:$0xf0]  ;;  %v1428_v46 = vor.u32 %v1620_v43, %v1427_v39  ;;  %v1320_v47 = vor.u32 %v1593_v41, %v1319_v40  ;;  %v1307_v50 = vld [vmem:[#allocation4 + $0x120] sm:$0xf] }
  0x1b   :  { %858 = vmatpush.bf16.msrb.mxu1 %v1344_v28  ;;  %1159 = vmatmul.msk.bf16.vlgmr.msra.gmra.mxu2 %vm133_vm0, %v1798_v20  ;;  %v1415_v48 = vld [vmem:[#allocation4 + $0x1f8] sm:$0xf]  ;;  %v1617_v49 = vld [vmem:[#allocation4 + $0x200] sm:$0xf0]  ;;  %v1590_v51 = vld [vmem:[#allocation4 + $0x128] sm:$0xf0]  ;;  %v1224_v52 = vor.u32 %v1569_v45, %v1223_v44 }
  0x1c   :  { %1158 = vmatmul.msk.bf16.vlgmr.msra.gmra.mxu1 %vm133_vm0, %v1798_v20  ;;  %871 = vmatpush.bf16.msrb.mxu2 %v1440_v36  ;;  %v1211_v53 = vld [vmem:[#allocation4 + $0x60] sm:$0xf]  ;;  %v1566_v54 = vld [vmem:[#allocation4 + $0x68] sm:$0xf0]  ;;  %v1416_v55 = vor.u32 %v1617_v49, %v1415_v48  ;;  %v1535_v56 = vld [vmem:[#allocation4 + $0x2e8] sm:$0xf]  ;;  %v1308_v58 = vor.u32 %v1590_v51, %v1307_v50 }
  0x1d   :  { %v1647_v57 = vld [vmem:[#allocation4 + $0x2f0] sm:$0xf0]  ;;  %v1403_v59 = vld [vmem:[#allocation4 + $0x1e0] sm:$0xf]  ;;  %v1614_v60 = vld [vmem:[#allocation4 + $0x1e8] sm:$0xf0]  ;;  %v1212_v0 = vor.u32 %v1566_v54, %v1211_v53 }
  0x1e   :  { %183 = vmatpush.bf16.msrb.mxu3 %v1140_v34  ;;  %846 = vmatpush.bf16.msra.mxu0 %v1236_v42  ;;  %v1536_v61 = vor.u32 %v1647_v57, %v1535_v56  ;;  %v1295_v62 = vld [vmem:[#allocation4 + $0x108] sm:$0xf]  ;;  %v1587_v63 = vld [vmem:[#allocation4 + $0x110] sm:$0xf0]  ;;  %v1523_v3 = vld [vmem:[#allocation4 + $0x2d0] sm:$0xf]  ;;  %v1404_v5 = vor.u32 %v1614_v60, %v1403_v59 }
  0x1f   :  { %859 = vmatpush.bf16.msrb.mxu1 %v1332_v35  ;;  %v1199_v1 = vld [vmem:[#allocation4 + $0x48] sm:$0xf]  ;;  %v1563_v2 = vld [vmem:[#allocation4 + $0x50] sm:$0xf0]  ;;  %v1644_v4 = vld [vmem:[#allocation4 + $0x2d8] sm:$0xf0]  ;;  %v1296_v7 = vor.u32 %v1587_v63, %v1295_v62 }
  0x20   :  { %872 = vmatpush.bf16.msrb.mxu2 %v1428_v46  ;;  %v1524_v6 = vor.u32 %v1644_v4, %v1523_v3  ;;  %v1283_v8 = vld [vmem:[#allocation4 + $0xf0] sm:$0xf]  ;;  %v1391_v9 = vld [vmem:[#allocation4 + $0x1c8] sm:$0xf]  ;;  %v1611_v10 = vld [vmem:[#allocation4 + $0x1d0] sm:$0xf0]  ;;  %v1200_v12 = vor.u32 %v1563_v2, %v1199_v1 }
  0x21   :  { %v1584_v11 = vld [vmem:[#allocation4 + $0xf8] sm:$0xf0]  ;;  %v1511_v13 = vld [vmem:[#allocation4 + $0x2b8] sm:$0xf]  ;;  %v1641_v14 = vld [vmem:[#allocation4 + $0x2c0] sm:$0xf0]  ;;  %v1392_v18 = vor.u32 %v1611_v10, %v1391_v9 }
  0x22   :  { %847 = vmatpush.bf16.msra.mxu0 %v1224_v52  ;;  %884 = vmatpush.bf16.msra.mxu3 %v1536_v61  ;;  %v1187_v15 = vld [vmem:[#allocation4 + $0x30] sm:$0xf]  ;;  %v1560_v16 = vld [vmem:[#allocation4 + $0x38] sm:$0xf0]  ;;  %v1512_v17 = vor.u32 %v1641_v14, %v1511_v13  ;;  %v1284_v21 = vor.u32 %v1584_v11, %v1283_v8  ;;  %v1499_v23 = vld [vmem:[#allocation4 + $0x2a0] sm:$0xf] }
  0x23   :  { %860 = vmatpush.bf16.msrb.mxu1 %v1320_v47  ;;  %v1379_v19 = vld [vmem:[#allocation4 + $0x1b0] sm:$0xf]  ;;  %v1608_v22 = vld [vmem:[#allocation4 + $0x1b8] sm:$0xf0]  ;;  %v1638_v24 = vld [vmem:[#allocation4 + $0x2a8] sm:$0xf0]  ;;  %v1188_v27 = vor.u32 %v1560_v16, %v1187_v15 }
  0x24   :  { %873 = vmatpush.bf16.msrb.mxu2 %v1416_v55  ;;  %v1271_v25 = vld [vmem:[#allocation4 + $0xd8] sm:$0xf]  ;;  %v1581_v26 = vld [vmem:[#allocation4 + $0xe0] sm:$0xf0]  ;;  %v1500_v30 = vor.u32 %v1638_v24, %v1499_v23  ;;  %v1380_v31 = vor.u32 %v1608_v22, %v1379_v19  ;;  %v1487_v32 = vld [vmem:[#allocation4 + $0x288] sm:$0xf] }
  0x25   :  { %v1175_v28 = vld [vmem:[#allocation4 + $0x18] sm:$0xf]  ;;  %v1557_v29 = vld [vmem:[#allocation4 + $0x20] sm:$0xf0]  ;;  %v1635_v33 = vld [vmem:[#allocation4 + $0x290] sm:$0xf0]  ;;  %v1272_v34 = vor.u32 %v1581_v26, %v1271_v25 }
  0x26   :  { %848 = vmatpush.bf16.msra.mxu0 %v1212_v0  ;;  %885 = vmatpush.bf16.msra.mxu3 %v1524_v6  ;;  %v1259_v35 = vld [vmem:[#allocation4 + $0xc0] sm:$0xf]  ;;  %v1367_v36 = vld [vmem:[#allocation4 + $0x198] sm:$0xf]  ;;  %v1605_v37 = vld [vmem:[#allocation4 + $0x1a0] sm:$0xf0]  ;;  %v1176_v40 = vor.u32 %v1557_v29, %v1175_v28  ;;  %v1488_v44 = vor.u32 %v1635_v33, %v1487_v32 }
  0x27   :  { %861 = vmatpush.bf16.msrb.mxu1 %v1308_v58  ;;  %v1578_v38 = vld [vmem:[#allocation4 + $0xc8] sm:$0xf0]  ;;  %v1345_v39 = vld [vmem:[#allocation4 + $0x174] sm:$0xf0]  ;;  %v1163_v41 = vld [vmem:[#allocation4] sm:$0xf]  ;;  %v1368_v45 = vor.u32 %v1605_v37, %v1367_v36 }
  0x28   :  { %874 = vmatpush.bf16.msrb.mxu2 %v1404_v5  ;;  %v1554_v42 = vld [vmem:[#allocation4 + $0x8] sm:$0xf0]  ;;  %v1249_v46 = vld [vmem:[#allocation4 + $0xb4] sm:$0xf0]  ;;  %v1475_v47 = vld [vmem:[#allocation4 + $0x270] sm:$0xf]  ;;  %v1260_v49 = vor.u32 %v1578_v38, %v1259_v35 }
  0x29   :  { %1160 = vmatmul.msk.bf16.vlgmr.msrb.gmra.mxu3 %vm133_vm0, %v1798_v20  ;;  %v1598_v20 = vld [vmem:[#allocation4 + $0x16c] sm:$0xf]  ;;  %v1632_v48 = vld [vmem:[#allocation4 + $0x278] sm:$0xf0]  ;;  %v1355_v50 = vld [vmem:[#allocation4 + $0x180] sm:$0xf]  ;;  %v1164_v54 = vor.u32 %v1554_v42, %v1163_v41 }
  0x2a   :  { %849 = vmatpush.bf16.msra.mxu0 %v1200_v12  ;;  %886 = vmatpush.bf16.msra.mxu3 %v1512_v17  ;;  %v1574_v43 = vld [vmem:[#allocation4 + $0xac] sm:$0xf]  ;;  %v1348_v52 = vor.u32 %v1598_v20, %v1345_v39  ;;  %v1595_v53 = vld [vmem:[#allocation4 + $0x154] sm:$0xf]  ;;  %v1441_v56 = vld [vmem:[#allocation4 + $0x234] sm:$0xf0]  ;;  %v1476_v61 = vor.u32 %v1632_v48, %v1475_v47 }
  0x2b   :  { %862 = vmatpush.bf16.msrb.mxu1 %v1296_v7  ;;  %v1602_v51 = vld [vmem:[#allocation4 + $0x188] sm:$0xf0]  ;;  %v1333_v57 = vld [vmem:[#allocation4 + $0x15c] sm:$0xf0]  ;;  %v1252_v58 = vor.u32 %v1574_v43, %v1249_v46  ;;  %v1571_v59 = vld [vmem:[#allocation4 + $0x94] sm:$0xf] }
  0x2c   :  { %875 = vmatpush.bf16.msrb.mxu2 %v1392_v18  ;;  %v1622_v55 = vld [vmem:[#allocation4 + $0x22c] sm:$0xf]  ;;  %v1237_v60 = vld [vmem:[#allocation4 + $0x9c] sm:$0xf0]  ;;  %v1356_v62 = vor.u32 %v1602_v51, %v1355_v50  ;;  %v1463_v63 = vld [vmem:[#allocation4 + $0x258] sm:$0xf]  ;;  %v1336_v2 = vor.u32 %v1595_v53, %v1333_v57 }
  0x2d   :  { %v1629_v0 = vld [vmem:[#allocation4 + $0x260] sm:$0xf0]  ;;  %v1444_v1 = vor.u32 %v1622_v55, %v1441_v56  ;;  %v1619_v3 = vld [vmem:[#allocation4 + $0x214] sm:$0xf]  ;;  %v1429_v4 = vld [vmem:[#allocation4 + $0x21c] sm:$0xf0]  ;;  %v1240_v7 = vor.u32 %v1571_v59, %v1237_v60 }
  0x2e   :  { %850 = vmatpush.bf16.msra.mxu0 %v1188_v27  ;;  %887 = vmatpush.bf16.msra.mxu3 %v1500_v30  ;;  %v1592_v5 = vld [vmem:[#allocation4 + $0x13c] sm:$0xf]  ;;  %v1321_v6 = vld [vmem:[#allocation4 + $0x144] sm:$0xf0]  ;;  %v1464_v8 = vor.u32 %v1629_v0, %v1463_v63  ;;  %v1432_v11 = vor.u32 %v1619_v3, %v1429_v4  ;;  %v1589_v15 = vld [vmem:[#allocation4 + $0x124] sm:$0xf] }
  0x2f   :  { %863 = vmatpush.bf16.msrb.mxu1 %v1284_v21  ;;  %v1568_v9 = vld [vmem:[#allocation4 + $0x7c] sm:$0xf]  ;;  %v1225_v10 = vld [vmem:[#allocation4 + $0x84] sm:$0xf0]  ;;  %v1324_v12 = vor.u32 %v1592_v5, %v1321_v6  ;;  %v1309_v16 = vld [vmem:[#allocation4 + $0x12c] sm:$0xf0] }
  0x30   :  { %876 = vmatpush.bf16.msrb.mxu2 %v1380_v31  ;;  %v1616_v13 = vld [vmem:[#allocation4 + $0x1fc] sm:$0xf]  ;;  %v1417_v14 = vld [vmem:[#allocation4 + $0x204] sm:$0xf0]  ;;  %v1228_v17 = vor.u32 %v1568_v9, %v1225_v10  ;;  %v1565_v18 = vld [vmem:[#allocation4 + $0x64] sm:$0xf]  ;;  %v1312_v22 = vor.u32 %v1589_v15, %v1309_v16 }
  0x31   :  { %v1213_v19 = vld [vmem:[#allocation4 + $0x6c] sm:$0xf0]  ;;  %v1420_v21 = vor.u32 %v1616_v13, %v1417_v14  ;;  %v1613_v23 = vld [vmem:[#allocation4 + $0x1e4] sm:$0xf]  ;;  %v1586_v25 = vld [vmem:[#allocation4 + $0x10c] sm:$0xf] }
  0x32   :  { %851 = vmatpush.bf16.msra.mxu0 %v1176_v40  ;;  %888 = vmatpush.bf16.msra.mxu3 %v1488_v44  ;;  %v1405_v24 = vld [vmem:[#allocation4 + $0x1ec] sm:$0xf0]  ;;  %v1297_v26 = vld [vmem:[#allocation4 + $0x114] sm:$0xf0]  ;;  %v1216_v27 = vor.u32 %v1565_v18, %v1213_v19  ;;  %v1583_v30 = vld [vmem:[#allocation4 + $0xf4] sm:$0xf] }
  0x33   :  { %864 = vmatpush.bf16.msrb.mxu1 %v1272_v34  ;;  %v1408_v28 = vor.u32 %v1613_v23, %v1405_v24  ;;  %v1300_v29 = vor.u32 %v1586_v25, %v1297_v26  ;;  %v1285_v31 = vld [vmem:[#allocation4 + $0xfc] sm:$0xf0]  ;;  %v1626_v34 = vld [vmem:[#allocation4 + $0x248] sm:$0xf0]  ;;  %v1201_v37 = vld [vmem:[#allocation4 + $0x54] sm:$0xf0] }
  0x34   :  { %877 = vmatpush.bf16.msrb.mxu2 %v1368_v45  ;;  %v1288_v32 = vor.u32 %v1583_v30, %v1285_v31  ;;  %v1451_v33 = vld [vmem:[#allocation4 + $0x240] sm:$0xf]  ;;  %v1562_v36 = vld [vmem:[#allocation4 + $0x4c] sm:$0xf]  ;;  %v1393_v39 = vld [vmem:[#allocation4 + $0x1d4] sm:$0xf0] }
  0x35   :  { %v1452_v35 = vor.u32 %v1626_v34, %v1451_v33  ;;  %v1610_v38 = vld [vmem:[#allocation4 + $0x1cc] sm:$0xf]  ;;  %v1204_v20 = vor.u32 %v1562_v36, %v1201_v37  ;;  %v1537_v41 = vld [vmem:[#allocation4 + $0x2f4] sm:$0xf0]  ;;  %v1580_v44 = vld [vmem:[#allocation4 + $0xdc] sm:$0xf] }
  0x36   :  { %852 = vmatpush.bf16.msra.mxu0 %v1164_v54  ;;  %889 = vmatpush.bf16.msra.mxu3 %v1476_v61  ;;  %v1646_v40 = vld [vmem:[#allocation4 + $0x2ec] sm:$0xf]  ;;  %v1396_v42 = vor.u32 %v1610_v38, %v1393_v39  ;;  %v1273_v45 = vld [vmem:[#allocation4 + $0xe4] sm:$0xf0]  ;;  %v1559_v47 = vld [vmem:[#allocation4 + $0x34] sm:$0xf] }
  0x37   :  { %865 = vmatpush.bf16.msrb.mxu1 %v1260_v49  ;;  %v1540_v43 = vor.u32 %v1646_v40, %v1537_v41  ;;  %v1276_v46 = vor.u32 %v1580_v44, %v1273_v45  ;;  %v1189_v48 = vld [vmem:[#allocation4 + $0x3c] sm:$0xf0]  ;;  %v1607_v49 = vld [vmem:[#allocation4 + $0x1b4] sm:$0xf]  ;;  %v1577_v56 = vld [vmem:[#allocation4 + $0xc4] sm:$0xf] }
  0x38   :  { %878 = vmatpush.bf16.msrb.mxu2 %v1356_v62  ;;  %v1192_v50 = vor.u32 %v1559_v47, %v1189_v48  ;;  %v1381_v51 = vld [vmem:[#allocation4 + $0x1bc] sm:$0xf0]  ;;  %v1261_v57 = vld [vmem:[#allocation4 + $0xcc] sm:$0xf0]  ;;  %v1556_v59 = vld [vmem:[#allocation4 + $0x1c] sm:$0xf] }
  0x39   :  { %v1525_v53 = vld [vmem:[#allocation4 + $0x2dc] sm:$0xf0]  ;;  %v1384_v54 = vor.u32 %v1607_v49, %v1381_v51  ;;  %v1177_v60 = vld [vmem:[#allocation4 + $0x24] sm:$0xf0]  ;;  %v1604_v61 = vld [vmem:[#allocation4 + $0x19c] sm:$0xf] }
  0x3a   :  { %897 = vmatpush.bf16.msrb.mxu0 %v1252_v58  ;;  %890 = vmatpush.bf16.msra.mxu3 %v1464_v8  ;;  %v1264_v58 = vor.u32 %v1577_v56, %v1261_v57  ;;  %v1180_v62 = vor.u32 %v1556_v59, %v1177_v60  ;;  %v1369_v63 = vld [vmem:[#allocation4 + $0x1a4] sm:$0xf0]  ;;  %v1640_v0 = vld [vmem:[#allocation4 + $0x2bc] sm:$0xf]  ;;  %v1553_v4 = vld [vmem:[#allocation4 + $0x4] sm:$0xf] }
  0x3b   :  { %910 = vmatpush.bf16.msra.mxu1 %v1348_v52  ;;  %v1643_v52 = vld [vmem:[#allocation4 + $0x2d4] sm:$0xf]  ;;  %v1165_v5 = vld [vmem:[#allocation4 + $0xc] sm:$0xf0]  ;;  %v1601_v6 = vld [vmem:[#allocation4 + $0x184] sm:$0xf] }
  0x3c   :  { %923 = vmatpush.bf16.msra.mxu2 %v1444_v1  ;;  %v1528_v55 = vor.u32 %v1643_v52, %v1525_v53  ;;  %v1513_v1 = vld [vmem:[#allocation4 + $0x2c4] sm:$0xf0]  ;;  %v1357_v8 = vld [vmem:[#allocation4 + $0x18c] sm:$0xf0]  ;;  %v1637_v9 = vld [vmem:[#allocation4 + $0x2a4] sm:$0xf] }
  0x3d   :  { %v1516_v3 = vor.u32 %v1640_v0, %v1513_v1  ;;  %v1501_v10 = vld [vmem:[#allocation4 + $0x2ac] sm:$0xf0]  ;;  %v1634_v13 = vld [vmem:[#allocation4 + $0x28c] sm:$0xf]  ;;  %v1489_v14 = vld [vmem:[#allocation4 + $0x294] sm:$0xf0] }
  0x3e   :  { %898 = vmatpush.bf16.msrb.mxu0 %v1240_v7  ;;  %891 = vmatpush.bf16.msra.mxu3 %v1452_v35  ;;  %v1168_v7 = vor.u32 %v1553_v4, %v1165_v5  ;;  %v1492_v15 = vor.u32 %v1634_v13, %v1489_v14  ;;  %v1631_v16 = vld [vmem:[#allocation4 + $0x274] sm:$0xf]  ;;  %v1628_v19 = vld [vmem:[#allocation4 + $0x25c] sm:$0xf]  ;;  %v1811_v23 = vld [vmem:[%s1848_s2] sm:$0xf] }
  0x3f   :  { %911 = vmatpush.bf16.msra.mxu1 %v1336_v2  ;;  %v1372_v2 = vor.u32 %v1604_v61, %v1369_v63  ;;  %v1625_v24 = vld [vmem:[#allocation4 + $0x244] sm:$0xf]  ;;  %v1453_v25 = vld [vmem:[#allocation4 + $0x24c] sm:$0xf0]  ;;  %v1600_v31 = vld [vmem:[#allocation4 + $0x178] sm:$0xf0] }
  0x40   :  { %924 = vmatpush.bf16.msra.mxu2 %v1432_v11  ;;  %v1360_v11 = vor.u32 %v1601_v6, %v1357_v8  ;;  %v1456_v26 = vor.u32 %v1625_v24, %v1453_v25  ;;  %v1351_v30 = vld [vmem:[#allocation4 + $0x170] sm:$0xf]  ;;  %v87_v34 = vperm.slane %v1811_v23, 2  ;;  %v1339_v38 = vld [vmem:[#allocation4 + $0x158] sm:$0xf] }
  0x41   :  { %v1352_v35 = vor.u32 %v1600_v31, %v1351_v30  ;;  %v1255_v41 = vld [vmem:[#allocation4 + $0xb0] sm:$0xf]  ;;  %v1624_v45 = vld [vmem:[#allocation4 + $0x238] sm:$0xf0]  ;;  %v1327_v51 = vld [vmem:[#allocation4 + $0x140] sm:$0xf] }
  0x42   :  { %899 = vmatpush.bf16.msrb.mxu0 %v1228_v17  ;;  %936 = vmatpush.bf16.msrb.mxu3 %v1540_v43  ;;  %v1477_v17 = vld [vmem:[#allocation4 + $0x27c] sm:$0xf0]  ;;  %v1447_v44 = vld [vmem:[#allocation4 + $0x230] sm:$0xf]  ;;  %v1594_v52 = vld [vmem:[#allocation4 + $0x148] sm:$0xf0] }
  0x43   :  { %912 = vmatpush.bf16.msra.mxu1 %v1324_v12  ;;  %v1504_v12 = vor.u32 %v1637_v9, %v1501_v10  ;;  %v1480_v18 = vor.u32 %v1631_v16, %v1477_v17  ;;  %v1573_v56 = vld [vmem:[#allocation4 + $0xa0] sm:$0xf0]  ;;  %v1328_v60 = vor.u32 %v1594_v52, %v1327_v51  ;;  %v1315_v63 = vld [vmem:[#allocation4 + $0x128] sm:$0xf]  ;;  %v1591_v0 = vld [vmem:[#allocation4 + $0x130] sm:$0xf0] }
  0x44   :  { %925 = vmatpush.bf16.msra.mxu2 %v1420_v21  ;;  %v1465_v21 = vld [vmem:[#allocation4 + $0x264] sm:$0xf0]  ;;  %v1621_v59 = vld [vmem:[#allocation4 + $0x220] sm:$0xf0]  ;;  %v1570_v4 = vld [vmem:[#allocation4 + $0x88] sm:$0xf0] }
  0x45   :  { %v1423_v5 = vld [vmem:[#allocation4 + $0x200] sm:$0xf]  ;;  %v1618_v6 = vld [vmem:[#allocation4 + $0x208] sm:$0xf0]  ;;  %v1303_v9 = vld [vmem:[#allocation4 + $0x110] sm:$0xf] }
  0x46   :  { %900 = vmatpush.bf16.msrb.mxu0 %v1216_v27  ;;  %937 = vmatpush.bf16.msrb.mxu3 %v1528_v55  ;;  %v86_v27 = vperm.slane %v1811_v23, 1  ;;  %v1243_v55 = vld [vmem:[#allocation4 + $0x98] sm:$0xf]  ;;  %v1588_v10 = vld [vmem:[#allocation4 + $0x118] sm:$0xf0] }
  0x47   :  { %913 = vmatpush.bf16.msra.mxu1 %v1312_v22  ;;  %v1468_v22 = vor.u32 %v1628_v19, %v1465_v21  ;;  %v1219_v13 = vld [vmem:[#allocation4 + $0x68] sm:$0xf]  ;;  %v1567_v14 = vld [vmem:[#allocation4 + $0x70] sm:$0xf0]  ;;  %v1304_v17 = vor.u32 %v1588_v10, %v1303_v9  ;;  %v1291_v21 = vld [vmem:[#allocation4 + $0xf8] sm:$0xf] }
  0x48   :  { %926 = vmatpush.bf16.msra.mxu2 %v1408_v28  ;;  %v1615_v16 = vld [vmem:[#allocation4 + $0x1f0] sm:$0xf0]  ;;  %v1220_v19 = vor.u32 %v1567_v14, %v1219_v13  ;;  %v1543_v31 = vld [vmem:[#allocation4 + $0x2f0] sm:$0xf]  ;;  %v1183_v51 = vld [vmem:[#allocation4 + $0x20] sm:$0xf] }
  0x49   :  { %v1495_v9 = vld [vmem:[#allocation4 + $0x290] sm:$0xf]  ;;  %v1636_v10 = vld [vmem:[#allocation4 + $0x298] sm:$0xf0]  ;;  %v1633_v13 = vld [vmem:[#allocation4 + $0x280] sm:$0xf0] }
  0x4a   :  { %901 = vmatpush.bf16.msrb.mxu0 %v1204_v20  ;;  %938 = vmatpush.bf16.msrb.mxu3 %v1516_v3  ;;  %v1597_v20 = vld [vmem:[#allocation4 + $0x160] sm:$0xf0]  ;;  %v1231_v3 = vld [vmem:[#allocation4 + $0x80] sm:$0xf] }
  0x4b   :  { %914 = vmatpush.bf16.msra.mxu1 %v1300_v29  ;;  %v1340_v47 = vor.u32 %v1597_v20, %v1339_v38  ;;  %v1232_v8 = vor.u32 %v1570_v4, %v1231_v3  ;;  %v1195_v20 = vld [vmem:[#allocation4 + $0x38] sm:$0xf]  ;;  %v1603_v3 = vld [vmem:[#allocation4 + $0x190] sm:$0xf0]  ;;  %v1507_v4 = vld [vmem:[#allocation4 + $0x2a8] sm:$0xf] }
  0x4c   :  { %927 = vmatpush.bf16.msra.mxu2 %v1396_v42  ;;  %v1576_v42 = vld [vmem:[#allocation4 + $0xb8] sm:$0xf0] }
  0x4e   :  { %902 = vmatpush.bf16.msrb.mxu0 %v1192_v50  ;;  %939 = vmatpush.bf16.msrb.mxu3 %v1504_v12  ;;  %v1256_v50 = vor.u32 %v1576_v42, %v1255_v41  ;;  %v1424_v12 = vor.u32 %v1618_v6, %v1423_v5  ;;  %v1387_v41 = vld [vmem:[#allocation4 + $0x1b8] sm:$0xf]  ;;  %v1609_v42 = vld [vmem:[#allocation4 + $0x1c0] sm:$0xf0]  ;;  %v1639_v5 = vld [vmem:[#allocation4 + $0x2b0] sm:$0xf0] }
  0x4f   :  { %915 = vmatpush.bf16.msra.mxu1 %v1288_v32  ;;  %v85_v32 = vperm.slane %v1811_v23, 0 }
  0x50   :  { %928 = vmatpush.bf16.msra.mxu2 %v1384_v54  ;;  %v1448_v54 = vor.u32 %v1624_v45, %v1447_v44  ;;  %v1531_v44 = vld [vmem:[#allocation4 + $0x2d8] sm:$0xf]  ;;  %v1645_v45 = vld [vmem:[#allocation4 + $0x2e0] sm:$0xf0] }
  0x51   :  { %v1532_v52 = vor.u32 %v1645_v45, %v1531_v44  ;;  %v1027_v44 = vld [vmem:[#allocation6 + $0xb8] sm:$0xff] }
  0x52   :  { %903 = vmatpush.bf16.msrb.mxu0 %v1180_v62  ;;  %940 = vmatpush.bf16.msrb.mxu3 %v1492_v15  ;;  %v1244_v62 = vor.u32 %v1573_v56, %v1243_v55  ;;  %v1411_v15 = vld [vmem:[#allocation4 + $0x1e8] sm:$0xf]  ;;  %v1375_v55 = vld [vmem:[#allocation4 + $0x1a0] sm:$0xf]  ;;  %v1606_v56 = vld [vmem:[#allocation4 + $0x1a8] sm:$0xf0] }
  0x53   :  { %916 = vmatpush.bf16.msra.mxu1 %v1276_v46  ;;  %v1412_v25 = vor.u32 %v1615_v16, %v1411_v15  ;;  %v1471_v15 = vld [vmem:[#allocation4 + $0x260] sm:$0xf]  ;;  %v1630_v16 = vld [vmem:[#allocation4 + $0x268] sm:$0xf0]  ;;  %v1051_v45 = vld [vmem:[#allocation6 + $0x178] sm:$0xff] }
  0x54   :  { %929 = vmatpush.bf16.msra.mxu2 %v1372_v2 }
  0x56   :  { %904 = vmatpush.bf16.msrb.mxu0 %v1168_v7  ;;  %941 = vmatpush.bf16.msrb.mxu3 %v1480_v18  ;;  %v1316_v7 = vor.u32 %v1591_v0, %v1315_v63  ;;  %v1171_v63 = vld [vmem:[#allocation4 + $0x8] sm:$0xf] }
  0x57   :  { %917 = vmatpush.bf16.msra.mxu1 %v1264_v58  ;;  %v1435_v58 = vld [vmem:[#allocation4 + $0x218] sm:$0xf] }
  0x58   :  { %930 = vmatpush.bf16.msra.mxu2 %v1360_v11  ;;  %v1436_v1 = vor.u32 %v1621_v59, %v1435_v58  ;;  %v88_v11 = vperm.slane %v1811_v23, 3  ;;  %v1399_v23 = vld [vmem:[#allocation4 + $0x1d0] sm:$0xf]  ;;  %v1519_v59 = vld [vmem:[#allocation4 + $0x2c0] sm:$0xf] }
  0x5a   :  { %942 = vmatpush.bf16.msrb.mxu3 %v1468_v22  ;;  %v1585_v22 = vld [vmem:[#allocation4 + $0x100] sm:$0xf0] }
  0x5b   :  { %v1292_v30 = vor.u32 %v1585_v22, %v1291_v21  ;;  %v1019_v21 = vld [vmem:[#allocation6 + $0x78] sm:$0xff]  ;;  %v1018_v22 = vld [vmem:[#allocation6 + $0x70] sm:$0xff] }
  0x5e   :  { %943 = vmatpush.bf16.msrb.mxu3 %v1456_v26  ;;  %v1207_v26 = vld [vmem:[#allocation4 + $0x50] sm:$0xf] }
  0x99   :  { %v159_v28 = vpop.f32.mrf.mxu1 }
  0x9a   :  { %v160_v29 = vadd.f32 %v159_v28, %v86_v27  ;;  %v1564_v27 = vld [vmem:[#allocation4 + $0x58] sm:$0xf0] }
  0x9b   :  { %v1612_v28 = vld [vmem:[#allocation4 + $0x1d8] sm:$0xf0] }
  0x9c   :  { %v190_v33 = vmax.f32 %v160_v29, 0.0  ;;  %v146_v37 = vpop.f32.mrf.mxu3  ;;  %v1400_v38 = vor.u32 %v1612_v28, %v1399_v23  ;;  %v1011_v23 = vld [vmem:[#allocation6 + $0x38] sm:$0xff] }
  0x9d   :  { %v147_v39 = vadd.f32 %v146_v37, %v85_v32  ;;  %v1648_v32 = vld [vmem:[#allocation4 + $0x2f8] sm:$0xf0]  ;;  %v1208_v37 = vor.u32 %v1564_v27, %v1207_v26  ;;  %v1013_v26 = vld [vmem:[#allocation6 + $0x48] sm:$0xff]  ;;  %v1012_v27 = vld [vmem:[#allocation6 + $0x40] sm:$0xff] }
  0x9e   :  { %v1816_v36 = vpack.c.bf16 %v190_v33, %v190_v33  ;;  %v172_v40 = vpop.f32.mrf.mxu2  ;;  %v1279_v33 = vld [vmem:[#allocation4 + $0xe0] sm:$0xf]  ;;  %v1035_v28 = vld [vmem:[#allocation6 + $0xf8] sm:$0xff] }
  0x9f   :  { %v173_v43 = vadd.f32 %v172_v40, %v87_v34  ;;  %v189_v46 = vmax.f32 %v147_v39, 0.0  ;;  %v1582_v34 = vld [vmem:[#allocation4 + $0xe8] sm:$0xf0]  ;;  %v1544_v39 = vor.u32 %v1648_v32, %v1543_v31  ;;  %v1561_v40 = vld [vmem:[#allocation4 + $0x40] sm:$0xf0] }
  0xa0   :  { %866 = vmatmul.bf16.vlgmr.msrb.gmra.mxu1 %v1816_v36  ;;  %v1009_v31 = vld [vmem:[#allocation6 + $0x28] sm:$0xff] }
  0xa1   :  { %962 = vmatpush.bf16.msrb.mxu1 %v1352_v35  ;;  %v161_v48 = vpop.f32.mrf.mxu1  ;;  %v191_v49 = vmax.f32 %v173_v43, 0.0  ;;  %v1819_v53 = vpack.c.bf16 %v189_v46, %v189_v46  ;;  %v1280_v43 = vor.u32 %v1582_v34, %v1279_v33  ;;  %v1033_v32 = vld [vmem:[#allocation6 + $0xe8] sm:$0xff]  ;;  %v1008_v33 = vld [vmem:[#allocation6 + $0x20] sm:$0xff] }
  0xa2   :  { %v1579_v48 = vld [vmem:[#allocation4 + $0xd0] sm:$0xf0]  ;;  %v1032_v34 = vld [vmem:[#allocation6 + $0xe0] sm:$0xff] }
  0xa3   :  { %v1821_v57 = vpack.c.bf16 %v191_v49, %v191_v49  ;;  %853 = vmatmul.bf16.vlgmr.msra.gmra.mxu0 %v1819_v53  ;;  %v1196_v49 = vor.u32 %v1561_v40, %v1195_v20  ;;  %v1030_v20 = vld [vmem:[#allocation6 + $0xd0] sm:$0xff]  ;;  %v1029_v40 = vld [vmem:[#allocation6 + $0xc8] sm:$0xff] }
  0xa4   :  { %v148_v61 = vpop.f32.mrf.mxu3  ;;  %949 = vmatpush.bf16.msra.mxu0 %v1256_v50  ;;  %v1388_v50 = vor.u32 %v1609_v42, %v1387_v41  ;;  %v1004_v42 = vld [vmem:[#allocation6] sm:$0xff] }
  0xa5   :  { %963 = vmatpush.bf16.msrb.mxu1 %v1340_v47  ;;  %879 = vmatmul.bf16.vlgmr.msrb.gmra.mxu2 %v1821_v57  ;;  %v1267_v47 = vld [vmem:[#allocation4 + $0xc8] sm:$0xf] }
  0xa6   :  { %975 = vmatpush.bf16.msrb.mxu2 %v1448_v54  ;;  %v174_v2 = vpop.f32.mrf.mxu2  ;;  %v1558_v54 = vld [vmem:[#allocation4 + $0x28] sm:$0xf0]  ;;  %v1268_v58 = vor.u32 %v1579_v48, %v1267_v47  ;;  %v1050_v47 = vld [vmem:[#allocation6 + $0x170] sm:$0xff] }
  0xa7   :  { %v1184_v61 = vor.u32 %v1558_v54, %v1183_v51  ;;  %v1363_v2 = vld [vmem:[#allocation4 + $0x188] sm:$0xf]  ;;  %v1048_v54 = vld [vmem:[#allocation6 + $0x160] sm:$0xff] }
  0xa8   :  { %950 = vmatpush.bf16.msra.mxu0 %v1244_v62  ;;  %v1376_v62 = vor.u32 %v1606_v56, %v1375_v55  ;;  %v1023_v55 = vld [vmem:[#allocation6 + $0x98] sm:$0xff] }
  0xa9   :  { %964 = vmatpush.bf16.msrb.mxu1 %v1328_v60  ;;  %v1642_v60 = vld [vmem:[#allocation4 + $0x2c8] sm:$0xf0]  ;;  %v1047_v56 = vld [vmem:[#allocation6 + $0x158] sm:$0xff] }
  0xaa   :  { %976 = vmatpush.bf16.msrb.mxu2 %v1436_v1  ;;  %v1520_v0 = vor.u32 %v1642_v60, %v1519_v59  ;;  %v1555_v1 = vld [vmem:[#allocation4 + $0x10] sm:$0xf0] }
  0xab   :  { %v1172_v6 = vor.u32 %v1555_v1, %v1171_v63  ;;  %v1022_v59 = vld [vmem:[#allocation6 + $0x90] sm:$0xff]  ;;  %v1021_v63 = vld [vmem:[#allocation6 + $0x88] sm:$0xff]  ;;  %v1020_v1 = vld [vmem:[#allocation6 + $0x80] sm:$0xff] }
  0xac   :  { %v185_v18 = vpop.f32.mrf.mxu3  ;;  %951 = vmatpush.bf16.msra.mxu0 %v1232_v8  ;;  %v1508_v8 = vor.u32 %v1639_v5, %v1507_v4  ;;  %v1046_v60 = vld [vmem:[#allocation6 + $0x150] sm:$0xff]  ;;  %v1043_v5 = vld [vmem:[#allocation6 + $0x138] sm:$0xff] }
  0xad   :  { %965 = vmatpush.bf16.msrb.mxu1 %v1316_v7  ;;  %v186_v24 = vadd.f32 %v185_v18, %v88_v11  ;;  %v1364_v7 = vor.u32 %v1603_v3, %v1363_v2  ;;  %v1496_v11 = vor.u32 %v1636_v10, %v1495_v9  ;;  %v1627_v18 = vld [vmem:[#allocation4 + $0x250] sm:$0xf0]  ;;  %v1044_v2 = vld [vmem:[#allocation6 + $0x140] sm:$0xff]  ;;  %v1041_v9 = vld [vmem:[#allocation6 + $0x128] sm:$0xff] }
  0xae   :  { %977 = vmatpush.bf16.msrb.mxu2 %v1424_v12  ;;  %v1483_v12 = vld [vmem:[#allocation4 + $0x278] sm:$0xf] }
  0xaf   :  { %v192_v29 = vmax.f32 %v186_v24, 0.0  ;;  %v1484_v14 = vor.u32 %v1633_v13, %v1483_v12  ;;  %v1015_v24 = vld [vmem:[#allocation6 + $0x58] sm:$0xff] }
  0xb0   :  { %918 = vmatmul.bf16.vlgmr.msra.gmra.mxu1 %v1816_v36  ;;  %952 = vmatpush.bf16.msra.mxu0 %v1220_v19 }
  0xb1   :  { %966 = vmatpush.bf16.msrb.mxu1 %v1304_v17  ;;  %v1827_v35 = vpack.c.bf16 %v192_v29, %v192_v29  ;;  %v1459_v17 = vld [vmem:[#allocation4 + $0x248] sm:$0xf]  ;;  %v1010_v29 = vld [vmem:[#allocation6 + $0x30] sm:$0xff] }
  0xb2   :  { %978 = vmatpush.bf16.msrb.mxu2 %v1412_v25  ;;  %v1460_v19 = vor.u32 %v1627_v18, %v1459_v17  ;;  %v1014_v25 = vld [vmem:[#allocation6 + $0x50] sm:$0xff] }
  0xb3   :  { %892 = vmatmul.bf16.vlgmr.msra.gmra.mxu3 %v1827_v35  ;;  %905 = vmatmul.bf16.vlgmr.msrb.gmra.mxu0 %v1819_v53  ;;  %v1038_v18 = vld [vmem:[#allocation6 + $0x110] sm:$0xff] }
  0xb4   :  { %v187_v46 = vpop.f32.mrf.mxu3  ;;  %953 = vmatpush.bf16.msra.mxu0 %v1208_v37  ;;  %988 = vmatpush.bf16.msra.mxu3 %v1544_v39  ;;  %v1031_v37 = vld [vmem:[#allocation6 + $0xd8] sm:$0xff]  ;;  %v1005_v39 = vld [vmem:[#allocation6 + $0x8] sm:$0xff] }
  0xb5   :  { %967 = vmatpush.bf16.msrb.mxu1 %v1292_v30  ;;  %931 = vmatmul.bf16.vlgmr.msra.gmra.mxu2 %v1821_v57  ;;  %v1034_v30 = vld [vmem:[#allocation6 + $0xf0] sm:$0xff] }
  0xb6   :  { %979 = vmatpush.bf16.msrb.mxu2 %v1400_v38  ;;  %v1006_v38 = vld [vmem:[#allocation6 + $0x10] sm:$0xff] }
  0xb7   :  { %v1026_v46 = vld [vmem:[#allocation6 + $0xb0] sm:$0xff] }
  0xb8   :  { %954 = vmatpush.bf16.msra.mxu0 %v1196_v49  ;;  %989 = vmatpush.bf16.msra.mxu3 %v1532_v52  ;;  %v1025_v49 = vld [vmem:[#allocation6 + $0xa8] sm:$0xff]  ;;  %v1024_v52 = vld [vmem:[#allocation6 + $0xa0] sm:$0xff] }
  0xb9   :  { %968 = vmatpush.bf16.msrb.mxu1 %v1280_v43  ;;  %v1028_v43 = vld [vmem:[#allocation6 + $0xc0] sm:$0xff] }
  0xba   :  { %980 = vmatpush.bf16.msrb.mxu2 %v1388_v50  ;;  %v1049_v50 = vld [vmem:[#allocation6 + $0x168] sm:$0xff] }
  0xbc   :  { %955 = vmatpush.bf16.msra.mxu0 %v1184_v61  ;;  %990 = vmatpush.bf16.msra.mxu3 %v1520_v0  ;;  %v325_v61 = vld [vmem:[%s1850_s4] sm:$0x7]  ;;  %v1045_v0 = vld [vmem:[#allocation6 + $0x148] sm:$0xff] }
  0xbd   :  { %969 = vmatpush.bf16.msrb.mxu1 %v1268_v58  ;;  %v327_v3 = vperm.slane %v325_v61, 0 }
  0xbe   :  { %981 = vmatpush.bf16.msrb.mxu2 %v1376_v62 }
  0xc0   :  { %970 = vmatmul.bf16.vlgmr.msrb.gmra.mxu1 %v1816_v36  ;;  %956 = vmatpush.bf16.msra.mxu0 %v1172_v6  ;;  %v1472_v36 = vor.u32 %v1630_v16, %v1471_v15 }
  0xc1   :  { %991 = vmatpush.bf16.msra.mxu3 %v1508_v8  ;;  %1076 = vmatpush.msra.mxu1 %v1035_v28  ;;  %v1042_v8 = vld [vmem:[#allocation6 + $0x130] sm:$0xff] }
  0xc2   :  { %982 = vmatpush.bf16.msrb.mxu2 %v1364_v7 }
  0xc3   :  { %944 = vmatmul.bf16.vlgmr.msrb.gmra.mxu3 %v1827_v35  ;;  %957 = vmatmul.bf16.vlgmr.msra.gmra.mxu0 %v1819_v53  ;;  %v1017_v53 = vld [vmem:[#allocation6 + $0x68] sm:$0xff] }
  0xc4   :  { %1056 = vmatpush.msrb.mxu0 %v1019_v21  ;;  %1077 = vmatpush.msra.mxu1 %v1034_v30 }
  0xc5   :  { %983 = vmatmul.bf16.vlgmr.msrb.gmra.mxu2 %v1821_v57  ;;  %992 = vmatpush.bf16.msra.mxu3 %v1496_v11  ;;  %v1016_v57 = vld [vmem:[#allocation6 + $0x60] sm:$0xff] }
  0xc6   :  { %1057 = vmatpush.msrb.mxu0 %v1018_v22  ;;  %1078 = vmatpush.msra.mxu1 %v1033_v32  ;;  %v1040_v11 = vld [vmem:[#allocation6 + $0x120] sm:$0xff]  ;;  %v1037_v22 = vld [vmem:[#allocation6 + $0x108] sm:$0xff] }
  0xc7   :  { %1096 = vmatpush.msra.mxu2 %v1051_v45 }
  0xc8   :  { %1058 = vmatpush.msrb.mxu0 %v1017_v53  ;;  %1079 = vmatpush.msra.mxu1 %v1032_v34  ;;  %v328_v53 = vperm.slane %v325_v61, 1 }
  0xc9   :  { %993 = vmatpush.bf16.msra.mxu3 %v1484_v14  ;;  %1097 = vmatpush.msra.mxu2 %v1050_v47  ;;  %v1039_v14 = vld [vmem:[#allocation6 + $0x118] sm:$0xff] }
  0xca   :  { %1059 = vmatpush.msrb.mxu0 %v1016_v57  ;;  %1080 = vmatpush.msra.mxu1 %v1031_v37  ;;  %v329_v37 = vperm.slane %v325_v61, 2 }
  0xcb   :  { %1098 = vmatpush.msra.mxu2 %v1049_v50 }
  0xcc   :  { %1060 = vmatpush.msrb.mxu0 %v1015_v24  ;;  %1081 = vmatpush.msra.mxu1 %v1030_v20  ;;  %v1036_v24 = vld [vmem:[#allocation6 + $0x100] sm:$0xff] }
  0xcd   :  { %994 = vmatpush.bf16.msra.mxu3 %v1472_v36  ;;  %1099 = vmatpush.msra.mxu2 %v1048_v54 }
  0xce   :  { %1061 = vmatpush.msrb.mxu0 %v1014_v25  ;;  %1082 = vmatpush.msra.mxu1 %v1029_v40 }
  0xcf   :  { %1100 = vmatpush.msra.mxu2 %v1047_v56 }
  0xd0   :  { %1062 = vmatpush.msrb.mxu0 %v1013_v26  ;;  %1083 = vmatpush.msra.mxu1 %v1028_v43 }
  0xd1   :  { %995 = vmatpush.bf16.msra.mxu3 %v1460_v19  ;;  %1101 = vmatpush.msra.mxu2 %v1046_v60 }
  0xd2   :  { %1063 = vmatpush.msrb.mxu0 %v1012_v27  ;;  %1084 = vmatpush.msra.mxu1 %v1027_v44 }
  0xd3   :  { %1102 = vmatpush.msra.mxu2 %v1045_v0 }
  0xd4   :  { %996 = vmatmul.bf16.vlgmr.msra.gmra.mxu3 %v1827_v35  ;;  %1064 = vmatpush.msrb.mxu0 %v1011_v23  ;;  %v1007_v35 = vld [vmem:[#allocation6 + $0x18] sm:$0xff] }
  0xd5   :  { %1085 = vmatpush.msra.mxu1 %v1026_v46  ;;  %1103 = vmatpush.msra.mxu2 %v1044_v2  ;;  %v1658_v46 = vld [vmem:[%s1852_s6] ss:$0 sm:$0xff] }
  0xd6   :  { %1065 = vmatpush.msrb.mxu0 %v1010_v29 }
  0xd7   :  { %1086 = vmatpush.msra.mxu1 %v1025_v49  ;;  %1104 = vmatpush.msra.mxu2 %v1043_v5 }
  0xd8   :  { %1066 = vmatpush.msrb.mxu0 %v1009_v31 }
  0xd9   :  { %1087 = vmatpush.msra.mxu1 %v1024_v52  ;;  %1105 = vmatpush.msra.mxu2 %v1042_v8 }
  0xda   :  { %1067 = vmatpush.msrb.mxu0 %v1008_v33 }
  0xdb   :  { %1088 = vmatpush.msra.mxu1 %v1023_v55  ;;  %1106 = vmatpush.msra.mxu2 %v1041_v9 }
  0xdc   :  { %1068 = vmatpush.msrb.mxu0 %v1007_v35 }
  0xdd   :  { %1089 = vmatpush.msra.mxu1 %v1022_v59  ;;  %1107 = vmatpush.msra.mxu2 %v1040_v11 }
  0xde   :  { %1069 = vmatpush.msrb.mxu0 %v1006_v38 }
  0xdf   :  { %1090 = vmatpush.msra.mxu1 %v1021_v63  ;;  %1108 = vmatpush.msra.mxu2 %v1039_v14 }
  0xe0   :  { %1070 = vmatpush.msrb.mxu0 %v1005_v39 }
  0xe1   :  { %1091 = vmatpush.msra.mxu1 %v1020_v1  ;;  %1109 = vmatpush.msra.mxu2 %v1038_v18 }
  0xe2   :  { %1071 = vmatpush.msrb.mxu0 %v1004_v42 }
  0xe3   :  { %1110 = vmatpush.msra.mxu2 %v1037_v22 }
  0xe5   :  { %1111 = vmatpush.msra.mxu2 %v1036_v24 }
 0x11d   :  { %v867_v41 = vpop.f32.mrf.mxu1 }
 0x120   :  { %v854_v48 = vpop.f32.mrf.mxu0 }
 0x121   :  { %v855_v6 = vadd.f32 %v854_v48, %v327_v3 }
 0x123   :  { %v868_v12 = vadd.f32 %v867_v41, %v855_v6 }
 0x125   :  { %v869_v51 = vpop.f32.mrf.mxu1 }
 0x128   :  { %v880_v58 = vpop.f32.mrf.mxu2  ;;  %v856_v62 = vpop.f32.mrf.mxu0 }
 0x129   :  { %v881_v15 = vadd.f32 %v880_v58, %v868_v12 }
 0x12d   :  { %v919_v4 = vpop.f32.mrf.mxu1 }
 0x130   :  { %v882_v7 = vpop.f32.mrf.mxu2  ;;  %v906_v10 = vpop.f32.mrf.mxu0 }
 0x131   :  { %v907_v26 = vadd.f32 %v906_v10, %v328_v53 }
 0x133   :  { %v920_v28 = vadd.f32 %v919_v4, %v907_v26 }
 0x135   :  { %v921_v13 = vpop.f32.mrf.mxu1 }
 0x136   :  { %v893_v16 = vpop.f32.mrf.mxu3 }
 0x137   :  { %v894_v36 = vadd.f32 %v893_v16, %v881_v15 }
 0x138   :  { %v932_v17 = vpop.f32.mrf.mxu2  ;;  %v908_v21 = vpop.f32.mrf.mxu0 }
 0x139   :  { %v1001_v19 = vmax.f32 %v894_v36, 0.0  ;;  %v933_v30 = vadd.f32 %v932_v17, %v920_v28 }
 0x13b   :  { %1072 = vmatmul.f32.vlgmr.msrb.gmra.mxu0 %v1001_v19 }
 0x13d   :  { %v971_v57 = vpop.f32.mrf.mxu1 }
 0x13e   :  { %v895_v25 = vpop.f32.mrf.mxu3 }
 0x140   :  { %v934_v27 = vpop.f32.mrf.mxu2  ;;  %v958_v23 = vpop.f32.mrf.mxu0 }
 0x141   :  { %v959_v39 = vadd.f32 %v958_v23, %v329_v37 }
 0x143   :  { %v972_v40 = vadd.f32 %v971_v57, %v959_v39 }
 0x145   :  { %v973_v29 = vpop.f32.mrf.mxu1 }
 0x146   :  { %v945_v31 = vpop.f32.mrf.mxu3 }
 0x147   :  { %v946_v32 = vadd.f32 %v945_v31, %v933_v30 }
 0x148   :  { %v984_v33 = vpop.f32.mrf.mxu2  ;;  %v960_v35 = vpop.f32.mrf.mxu0 }
 0x149   :  { %v1002_v34 = vmax.f32 %v946_v32, 0.0  ;;  %v985_v41 = vadd.f32 %v984_v33, %v972_v40 }
 0x14b   :  { %1092 = vmatmul.f32.vlgmr.msra.gmra.mxu1 %v1002_v34 }
 0x14e   :  { %v947_v38 = vpop.f32.mrf.mxu3 }
 0x150   :  { %v986_v20 = vpop.f32.mrf.mxu2 }
 0x157   :  { %v997_v42 = vpop.f32.mrf.mxu3 }
 0x158   :  { %v998_v43 = vadd.f32 %v997_v42, %v985_v41 }
 0x15a   :  { %v1003_v44 = vmax.f32 %v998_v43, 0.0 }
 0x15c   :  { %1112 = vmatmul.f32.vlgmr.msra.gmra.mxu2 %v1003_v44 }
 0x15f   :  { %v999_v45 = vpop.f32.mrf.mxu3 }
 0x1b8   :  { %v1073_v47 = vpop.f32.mrf.mxu0 }
 0x1b9   :  { %v1074_v49 = vadd.f32 %v1658_v46, %v1073_v47 }
 0x1c8   :  { %v1093_v48 = vpop.f32.mrf.mxu1 }
 0x1c9   :  { %v1094_v50 = vadd.f32 %v1093_v48, %v1074_v49 }
 0x1df   :  { %v1113_v51 = vpop.f32.mrf.mxu2 }
 0x1e0   :  { %v1114_v52 = vadd.f32 %v1113_v51, %v1094_v50 }
 0x1e2   :  { %1659 = vtanh.f32 %v1114_v52 }
 0x1e8   :  { %v1660_v54 = vpop.eup %1659 }
 0x1e9   :  { %v1117_v55 = vpack.c.bf16 %v1660_v54, %v1660_v54 }
 0x1eb   :  { %1118 = vst [vmem:[%s1853_s7] sm:$0xf] %v1117_v55 }
 0x1ec   :  { %1123 = vsyncpa [#allocation3], 1 }
 0x1ed   :  { %1124 = vsyncpa [#allocation5], 1 }

</bundles_post_ra>
